<compile_context>
chip_gen: v6e
topology: v6e:2x2x1
jax: 0.10.0
libtpu: 0.0.40
codegen_flags: <defaults>
</compile_context>

<pallas_src>
import functools
import math

import jax
import jax.numpy as jnp
from jax.experimental import pallas as pl
from jax.experimental.pallas import tpu as pltpu

LANES = 128            # vreg lane width
NUM_SPLIT = 2          # leading "parallel" grid axis, only used when N is large
MAX_BLOCK_ROWS = 2048  # (3, 2048, 128) f32 per input block -> 3 MiB, 12 MiB double-buffered


def _round_up(x, m):
    return (x + m - 1) // m * m


def _cdiv(a, b):
    return -(-a // b)


def _iou_loss_kernel(out_ref, tar_ref, loss_acc_ref, iou_acc_ref, *, n_boxes, block_rows):
    # out_ref/tar_ref: (3, block_rows, 128) f32 tiles (rows: x, y, size)
    # loss_acc_ref / iou_acc_ref: (8, 128) f32, VMEM-resident across the reduction axis
    c = pl.program_id(0)          # split index ("parallel", megacore shard on v7x)
    i = pl.program_id(1)          # reduction step over box tiles ("arbitrary")
    steps = pl.num_programs(1)

    @pl.when(i == 0)
    def _init():
        loss_acc_ref[...] = jnp.zeros_like(loss_acc_ref)
        iou_acc_ref[...] = jnp.zeros_like(iou_acc_ref)

    outx, outy, outs = out_ref[0], out_ref[1], out_ref[2]
    tarx, tary, tars = tar_ref[0], tar_ref[1], tar_ref[2]

    # Exact symmetric-box identity for 1-D interval overlap, including containment:
    #   min(a+r, b+s) - max(a-r, b-s) == (r + s) - max(|a - b|, |r - s|)
    # relu(.) of it matches the reference's disjoint-check + sorted-middle-two form.
    size_sum = outs + tars
    size_gap = jnp.abs(outs - tars)
    w = jnp.maximum(0.0, size_sum - jnp.maximum(jnp.abs(outx - tarx), size_gap))
    h = jnp.maximum(0.0, size_sum - jnp.maximum(jnp.abs(outy - tary), size_gap))

    overlap = w * h
    # (2r)^2 + (2s)^2 == 4*(r^2 + s^2)
    denom = 4.0 * (outs * outs + tars * tars) - overlap + 1e-7

    # Approx reciprocal on the EUP (free slot) + one Newton-Raphson refinement so the
    # ~2^-12 approx error does not bleed into the 1e-4 accuracy check through the log.
    inv = pl.reciprocal(denom, approx=True)
    inv = inv * (2.0 - denom * inv)
    iou = overlap * inv
    loss = -jnp.log(iou + 1e-7)

    tile_elems = block_rows * LANES
    tile_base = (c * steps + i) * tile_elems
    has_padding = tile_base + tile_elems > n_boxes   # scalar: only tail / overflow tiles

    def _reduce(x):
        # (block_rows, 128) -> (block_rows//8, 8, 128) is a sublane-tile-aligned split;
        # summing axis 0 is pure VPU adds of whole vregs (no XLU).
        return jnp.sum(x.reshape(block_rows // 8, 8, LANES), axis=0)

    @pl.when(jnp.logical_not(has_padding))
    def _steady():
        iou_acc_ref[...] += _reduce(iou)
        loss_acc_ref[...] += _reduce(loss)

    @pl.when(has_padding)
    def _tail():
        row = jax.lax.broadcasted_iota(jnp.int32, iou.shape, 0)
        lane = jax.lax.broadcasted_iota(jnp.int32, iou.shape, 1)
        gidx = tile_base + row * LANES + lane
        valid = gidx < n_boxes
        iou_acc_ref[...] += _reduce(jnp.where(valid, iou, 0.0))
        loss_acc_ref[...] += _reduce(jnp.where(valid, loss, 0.0))


@jax.jit
def iou_loss(outputs, targets):
    """outputs, targets: (N, 3) arrays of (x, y, size). Returns (loss, iou_sum) scalars."""
    outputs = jnp.asarray(outputs, jnp.float32)
    targets = jnp.asarray(targets, jnp.float32)
    n = int(outputs.shape[0])

    rows_needed = max(1, _cdiv(n, LANES))
    # One split (single grid column) whenever everything fits a single block; the second
    # split only exists so large-N runs can shard across v7x's two TensorCores.
    num_split = 1 if rows_needed <= MAX_BLOCK_ROWS else NUM_SPLIT
    block_rows = min(MAX_BLOCK_ROWS, _round_up(_cdiv(rows_needed, num_split), 8))
    steps = _cdiv(rows_needed, num_split * block_rows)
    total_rows = num_split * steps * block_rows
    padded_n = total_rows * LANES

    def _to_soa(aos):
        # Pad along N first, then transpose: under jit XLA emits one fused transpose-copy.
        padded = jnp.pad(aos, ((0, padded_n - n), (0, 0)))
        return padded.T.reshape(3, total_rows, LANES)   # lane- and sublane-dense layout

    out_soa = _to_soa(outputs)
    tar_soa = _to_soa(targets)

    kernel = functools.partial(_iou_loss_kernel, n_boxes=n, block_rows=block_rows)

    grid_spec = pltpu.PrefetchScalarGridSpec(
        num_scalar_prefetch=0,
        grid=(num_split, steps),
        in_specs=[
            pl.BlockSpec((3, block_rows, LANES), lambda c, i: (0, c * steps + i, 0)),
            pl.BlockSpec((3, block_rows, LANES), lambda c, i: (0, c * steps + i, 0)),
        ],
        out_specs=(
            # Same block across the reduction axis -> VMEM-resident accumulator per split.
            pl.BlockSpec((None, 8, LANES), lambda c, i: (c, 0, 0)),
            pl.BlockSpec((None, 8, LANES), lambda c, i: (c, 0, 0)),
        ),
    )

    loss_acc, iou_acc = pl.pallas_call(
        kernel,
        grid_spec=grid_spec,
        out_shape=(
            jax.ShapeDtypeStruct((num_split, 8, LANES), jnp.float32),
            jax.ShapeDtypeStruct((num_split, 8, LANES), jnp.float32),
        ),
        compiler_params=pltpu.CompilerParams(
            dimension_semantics=("parallel", "arbitrary"),
            vmem_limit_bytes=32 * 1024 * 1024,
        ),
        cost_estimate=pl.CostEstimate(
            flops=26 * padded_n,
            transcendentals=2 * padded_n,
            bytes_accessed=6 * 4 * padded_n + 2 * num_split * 8 * LANES * 4,
        ),
    )(out_soa, tar_soa)

    # Tiny (num_split, 8, 128) cross-lane reduction done by XLA outside the kernel.
    return jnp.sum(loss_acc), jnp.sum(iou_acc)


def _reference(outputs, targets):
    """Plain-Python reference replicating the PyTorch loop semantics (float64)."""
    o = jax.device_get(outputs).astype(float)
    t = jax.device_get(targets).astype(float)
    loss = 0.0
    iou_sum = 0.0
    for i in range(o.shape[0]):
        outx, outy, outs = o[i]
        tarx, tary, tars = t[i]
        oa = (2 * outs) ** 2
        ta = (2 * tars) ** 2
        ro, lo = outx + outs, outx - outs
        rt, lt = tarx + tars, tarx - tars
        bo, to = outy + outs, outy - outs
        bt, tt = tary + tars, tary - tars
        if rt <= lo or ro <= lt:
            w = 0.0
        else:
            xs = sorted([ro, lo, rt, lt])
            w = xs[2] - xs[1]
        if tt >= bo or to >= bt:
            h = 0.0
        else:
            ys = sorted([bo, to, bt, tt])
            h = ys[2] - ys[1]
        ov = w * h
        iou = ov / (oa + ta - ov + 1e-7)
        iou_sum += iou
        loss -= math.log(iou + 1e-7)
    return loss, iou_sum


if __name__ == "__main__":
    keys = jax.random.split(jax.random.PRNGKey(0), 8)

    # --- small case: N = 8 boxes (mirrors the original module's usage) ---
    N = 8
    out_xy = jax.random.uniform(keys[0], (N, 2), jnp.float32) * 10.0
    out_sz = jax.random.uniform(keys[1], (N, 1), jnp.float32) * 2.0 + 0.5
    tar_xy = out_xy + jax.random.uniform(keys[2], (N, 2), jnp.float32) * 2.0 - 1.0
    tar_sz = jax.random.uniform(keys[3], (N, 1), jnp.float32) * 2.0 + 0.5
    outputs = jnp.concatenate([out_xy, out_sz], axis=1)  # (N, 3)
    targets = jnp.concatenate([tar_xy, tar_sz], axis=1)  # (N, 3)

    loss, iou_sum = iou_loss(outputs, targets)
    jax.block_until_ready((loss, iou_sum))
    ref_loss, ref_iou = _reference(outputs, targets)
    assert jnp.allclose(loss, ref_loss, rtol=1e-4, atol=1e-4), (loss, ref_loss)
    assert jnp.allclose(iou_sum, ref_iou, rtol=1e-4, atol=1e-4), (iou_sum, ref_iou)

    # --- non-multiple-of-128 case: exercises tail masking (incl. containment boxes) ---
    M = 300
    out_xy = jax.random.uniform(keys[4], (M, 2), jnp.float32) * 10.0
    out_sz = jax.random.uniform(keys[5], (M, 1), jnp.float32) * 2.0 + 0.5
    tar_xy = out_xy + jax.random.uniform(keys[6], (M, 2), jnp.float32) * 4.0 - 2.0
    tar_sz = jax.random.uniform(keys[7], (M, 1), jnp.float32) * 2.0 + 0.5
    outputs2 = jnp.concatenate([out_xy, out_sz], axis=1)
    targets2 = jnp.concatenate([tar_xy, tar_sz], axis=1)

    loss2, iou2 = iou_loss(outputs2, targets2)
    jax.block_until_ready((loss2, iou2))
    ref_loss2, ref_iou2 = _reference(outputs2, targets2)
    assert jnp.allclose(loss2, ref_loss2, rtol=1e-4, atol=1e-3), (loss2, ref_loss2)
    assert jnp.allclose(iou2, ref_iou2, rtol=1e-4, atol=1e-3), (iou2, ref_iou2)

    print("KERNEL_OK")
</pallas_src>

<mosaic_0001>
module attributes {stable_mosaic.version = 11 : i64} {
  func.func @_iou_loss_kernel(%arg0: i32, %arg1: i32, %arg2: memref<3x8x128xf32, #tpu.memory_space<vmem>>, %arg3: memref<3x8x128xf32, #tpu.memory_space<vmem>>, %arg4: memref<1x8x128xf32, #tpu.memory_space<vmem>>, %arg5: memref<1x8x128xf32, #tpu.memory_space<vmem>>) attributes {dimension_semantics = [#tpu.dimension_semantics<parallel>, #tpu.dimension_semantics<arbitrary>], iteration_bounds = array<i64: 1, 1>, scalar_prefetch = 0 : i64, scratch_operands = 0 : i64, tpu.core_type = #tpu.core_type<tc>, window_params = [{transform_indices = @transform_0, window_bounds = array<i64: 3, 8, 128>}, {transform_indices = @transform_1, window_bounds = array<i64: 3, 8, 128>}, {transform_indices = @transform_2, window_bounds = array<i64: 1, 8, 128>}, {transform_indices = @transform_3, window_bounds = array<i64: 1, 8, 128>}]} {
    %c0_i32 = arith.constant 0 : i32
    %0 = arith.cmpi eq, %arg1, %c0_i32 : i32
    %1 = arith.extui %0 : i1 to i32
    %c0_i32_0 = arith.constant 0 : i32
    %2 = arith.cmpi ne, %1, %c0_i32_0 : i32
    scf.if %2 {
      %cst_25 = arith.constant 0.000000e+00 : f32
      %60 = vector.broadcast %cst_25 : f32 to vector<8x128xf32>
      %c0_26 = arith.constant 0 : index
      %c0_27 = arith.constant 0 : index
      %c0_28 = arith.constant 0 : index
      %61 = vector.load %arg4[%c0_26, %c0_27, %c0_28] : memref<1x8x128xf32, #tpu.memory_space<vmem>>, vector<1x8x128xf32>
      %62 = vector.shape_cast %61 : vector<1x8x128xf32> to vector<8x128xf32>
      %63 = vector.shape_cast %60 : vector<8x128xf32> to vector<1x8x128xf32>
      tpu.vector_store %arg4[%c0_26, %c0_27, %c0_28], %63 {strides = array<i32>} : memref<1x8x128xf32, #tpu.memory_space<vmem>>, vector<1x8x128xf32>,
      %cst_29 = arith.constant 0.000000e+00 : f32
      %64 = vector.broadcast %cst_29 : f32 to vector<8x128xf32>
      %c0_30 = arith.constant 0 : index
      %c0_31 = arith.constant 0 : index
      %c0_32 = arith.constant 0 : index
      %65 = vector.load %arg5[%c0_30, %c0_31, %c0_32] : memref<1x8x128xf32, #tpu.memory_space<vmem>>, vector<1x8x128xf32>
      %66 = vector.shape_cast %65 : vector<1x8x128xf32> to vector<8x128xf32>
      %67 = vector.shape_cast %64 : vector<8x128xf32> to vector<1x8x128xf32>
      tpu.vector_store %arg5[%c0_30, %c0_31, %c0_32], %67 {strides = array<i32>} : memref<1x8x128xf32, #tpu.memory_space<vmem>>, vector<1x8x128xf32>,
    } else {
    }
    %c0 = arith.constant 0 : index
    %c0_1 = arith.constant 0 : index
    %c0_2 = arith.constant 0 : index
    %3 = vector.load %arg2[%c0, %c0_1, %c0_2] : memref<3x8x128xf32, #tpu.memory_space<vmem>>, vector<1x8x128xf32>
    %4 = vector.shape_cast %3 : vector<1x8x128xf32> to vector<8x128xf32>
    %c1 = arith.constant 1 : index
    %c0_3 = arith.constant 0 : index
    %c0_4 = arith.constant 0 : index
    %5 = vector.load %arg2[%c1, %c0_3, %c0_4] : memref<3x8x128xf32, #tpu.memory_space<vmem>>, vector<1x8x128xf32>
    %6 = vector.shape_cast %5 : vector<1x8x128xf32> to vector<8x128xf32>
    %c2 = arith.constant 2 : index
    %c0_5 = arith.constant 0 : index
    %c0_6 = arith.constant 0 : index
    %7 = vector.load %arg2[%c2, %c0_5, %c0_6] : memref<3x8x128xf32, #tpu.memory_space<vmem>>, vector<1x8x128xf32>
    %8 = vector.shape_cast %7 : vector<1x8x128xf32> to vector<8x128xf32>
    %c0_7 = arith.constant 0 : index
    %c0_8 = arith.constant 0 : index
    %c0_9 = arith.constant 0 : index
    %9 = vector.load %arg3[%c0_7, %c0_8, %c0_9] : memref<3x8x128xf32, #tpu.memory_space<vmem>>, vector<1x8x128xf32>
    %10 = vector.shape_cast %9 : vector<1x8x128xf32> to vector<8x128xf32>
    %c1_10 = arith.constant 1 : index
    %c0_11 = arith.constant 0 : index
    %c0_12 = arith.constant 0 : index
    %11 = vector.load %arg3[%c1_10, %c0_11, %c0_12] : memref<3x8x128xf32, #tpu.memory_space<vmem>>, vector<1x8x128xf32>
    %12 = vector.shape_cast %11 : vector<1x8x128xf32> to vector<8x128xf32>
    %c2_13 = arith.constant 2 : index
    %c0_14 = arith.constant 0 : index
    %c0_15 = arith.constant 0 : index
    %13 = vector.load %arg3[%c2_13, %c0_14, %c0_15] : memref<3x8x128xf32, #tpu.memory_space<vmem>>, vector<1x8x128xf32>
    %14 = vector.shape_cast %13 : vector<1x8x128xf32> to vector<8x128xf32>
    %15 = arith.addf %8, %14 : vector<8x128xf32>
    %16 = arith.subf %8, %14 : vector<8x128xf32>
    %17 = math.absf %16 : vector<8x128xf32>
    %18 = arith.subf %4, %10 : vector<8x128xf32>
    %19 = math.absf %18 : vector<8x128xf32>
    %20 = arith.maximumf %19, %17 : vector<8x128xf32>
    %21 = arith.subf %15, %20 : vector<8x128xf32>
    %cst = arith.constant 0.000000e+00 : f32
    %22 = vector.broadcast %cst : f32 to vector<8x128xf32>
    %23 = arith.maximumf %22, %21 : vector<8x128xf32>
    %24 = arith.subf %6, %12 : vector<8x128xf32>
    %25 = math.absf %24 : vector<8x128xf32>
    %26 = arith.maximumf %25, %17 : vector<8x128xf32>
    %27 = arith.subf %15, %26 : vector<8x128xf32>
    %cst_16 = arith.constant 0.000000e+00 : f32
    %28 = vector.broadcast %cst_16 : f32 to vector<8x128xf32>
    %29 = arith.maximumf %28, %27 : vector<8x128xf32>
    %30 = arith.mulf %23, %29 : vector<8x128xf32>
    %31 = arith.mulf %8, %8 : vector<8x128xf32>
    %32 = arith.mulf %14, %14 : vector<8x128xf32>
    %33 = arith.addf %31, %32 : vector<8x128xf32>
    %cst_17 = arith.constant 4.000000e+00 : f32
    %34 = vector.broadcast %cst_17 : f32 to vector<8x128xf32>
    %35 = arith.mulf %34, %33 : vector<8x128xf32>
    %36 = arith.subf %35, %30 : vector<8x128xf32>
    %cst_18 = arith.constant 1.000000e-07 : f32
    %37 = vector.broadcast %cst_18 : f32 to vector<8x128xf32>
    %38 = arith.addf %36, %37 : vector<8x128xf32>
    %39 = tpu.reciprocal %38 {approx = true} : vector<8x128xf32> -> vector<8x128xf32>
    %40 = arith.mulf %38, %39 : vector<8x128xf32>
    %cst_19 = arith.constant 2.000000e+00 : f32
    %41 = vector.broadcast %cst_19 : f32 to vector<8x128xf32>
    %42 = arith.subf %41, %40 : vector<8x128xf32>
    %43 = arith.mulf %39, %42 : vector<8x128xf32>
    %44 = arith.mulf %30, %43 : vector<8x128xf32>
    %cst_20 = arith.constant 1.000000e-07 : f32
    %45 = vector.broadcast %cst_20 : f32 to vector<8x128xf32>
    %46 = arith.addf %44, %45 : vector<8x128xf32>
    %47 = math.log %46 : vector<8x128xf32>
    %cst_21 = arith.constant 0.000000e+00 : f32
    %48 = vector.broadcast %cst_21 : f32 to vector<8x128xf32>
    %49 = arith.subf %48, %47 : vector<8x128xf32>
    %c1_i32 = arith.constant 1 : i32
    %50 = arith.muli %arg0, %c1_i32 : i32
    %51 = arith.addi %50, %arg1 : i32
    %c1024_i32 = arith.constant 1024 : i32
    %52 = arith.muli %51, %c1024_i32 : i32
    %c1024_i32_22 = arith.constant 1024 : i32
    %53 = arith.addi %52, %c1024_i32_22 : i32
    %c8_i32 = arith.constant 8 : i32
    %54 = arith.cmpi sgt, %53, %c8_i32 : i32
    %true = arith.constant true
    %55 = arith.xori %54, %true : i1
    %56 = arith.extui %55 : i1 to i32
    %c0_i32_23 = arith.constant 0 : i32
    %57 = arith.cmpi ne, %56, %c0_i32_23 : i32
    scf.if %57 {
      %c0_25 = arith.constant 0 : index
      %c0_26 = arith.constant 0 : index
      %c0_27 = arith.constant 0 : index
      %60 = vector.load %arg5[%c0_25, %c0_26, %c0_27] : memref<1x8x128xf32, #tpu.memory_space<vmem>>, vector<1x8x128xf32>
      %61 = vector.shape_cast %60 : vector<1x8x128xf32> to vector<8x128xf32>
      %62 = vector.shape_cast %44 : vector<8x128xf32> to vector<1x8x128xf32>
      %cst_28 = arith.constant dense<0.000000e+00> : vector<8x128xf32>
      %63 = vector.multi_reduction <add>, %62, %cst_28 [0] : vector<1x8x128xf32> to vector<8x128xf32>
      %64 = arith.addf %61, %63 : vector<8x128xf32>
      %c0_29 = arith.constant 0 : index
      %c0_30 = arith.constant 0 : index
      %c0_31 = arith.constant 0 : index
      %65 = vector.load %arg5[%c0_29, %c0_30, %c0_31] : memref<1x8x128xf32, #tpu.memory_space<vmem>>, vector<1x8x128xf32>
      %66 = vector.shape_cast %65 : vector<1x8x128xf32> to vector<8x128xf32>
      %67 = vector.shape_cast %64 : vector<8x128xf32> to vector<1x8x128xf32>
      tpu.vector_store %arg5[%c0_29, %c0_30, %c0_31], %67 {strides = array<i32>} : memref<1x8x128xf32, #tpu.memory_space<vmem>>, vector<1x8x128xf32>,
      %c0_32 = arith.constant 0 : index
      %c0_33 = arith.constant 0 : index
      %c0_34 = arith.constant 0 : index
      %68 = vector.load %arg4[%c0_32, %c0_33, %c0_34] : memref<1x8x128xf32, #tpu.memory_space<vmem>>, vector<1x8x128xf32>
      %69 = vector.shape_cast %68 : vector<1x8x128xf32> to vector<8x128xf32>
      %70 = vector.shape_cast %49 : vector<8x128xf32> to vector<1x8x128xf32>
      %cst_35 = arith.constant dense<0.000000e+00> : vector<8x128xf32>
      %71 = vector.multi_reduction <add>, %70, %cst_35 [0] : vector<1x8x128xf32> to vector<8x128xf32>
      %72 = arith.addf %69, %71 : vector<8x128xf32>
      %c0_36 = arith.constant 0 : index
      %c0_37 = arith.constant 0 : index
      %c0_38 = arith.constant 0 : index
      %73 = vector.load %arg4[%c0_36, %c0_37, %c0_38] : memref<1x8x128xf32, #tpu.memory_space<vmem>>, vector<1x8x128xf32>
      %74 = vector.shape_cast %73 : vector<1x8x128xf32> to vector<8x128xf32>
      %75 = vector.shape_cast %72 : vector<8x128xf32> to vector<1x8x128xf32>
      tpu.vector_store %arg4[%c0_36, %c0_37, %c0_38], %75 {strides = array<i32>} : memref<1x8x128xf32, #tpu.memory_space<vmem>>, vector<1x8x128xf32>,
    } else {
    }
    %58 = arith.extui %54 : i1 to i32
    %c0_i32_24 = arith.constant 0 : i32
    %59 = arith.cmpi ne, %58, %c0_i32_24 : i32
    scf.if %59 {
      %60 = tpu.iota {dimensions = array<i32: 0>} : vector<8x128xi32>
      %61 = tpu.iota {dimensions = array<i32: 1>} : vector<8x128xi32>
      %c128_i32 = arith.constant 128 : i32
      %62 = vector.broadcast %c128_i32 : i32 to vector<8x128xi32>
      %63 = arith.muli %60, %62 : vector<8x128xi32>
      %64 = vector.broadcast %52 : i32 to vector<8x128xi32>
      %65 = arith.addi %64, %63 : vector<8x128xi32>
      %66 = arith.addi %65, %61 : vector<8x128xi32>
      %c8_i32_25 = arith.constant 8 : i32
      %67 = vector.broadcast %c8_i32_25 : i32 to vector<8x128xi32>
      %68 = arith.cmpi slt, %66, %67 : vector<8x128xi32>
      %c0_26 = arith.constant 0 : index
      %c0_27 = arith.constant 0 : index
      %c0_28 = arith.constant 0 : index
      %69 = vector.load %arg5[%c0_26, %c0_27, %c0_28] : memref<1x8x128xf32, #tpu.memory_space<vmem>>, vector<1x8x128xf32>
      %70 = vector.shape_cast %69 : vector<1x8x128xf32> to vector<8x128xf32>
      %cst_29 = arith.constant 0.000000e+00 : f32
      %71 = vector.broadcast %cst_29 : f32 to vector<8x128xf32>
      %72 = arith.select %68, %44, %71 : vector<8x128xi1>, vector<8x128xf32>
      %73 = vector.shape_cast %72 : vector<8x128xf32> to vector<1x8x128xf32>
      %cst_30 = arith.constant dense<0.000000e+00> : vector<8x128xf32>
      %74 = vector.multi_reduction <add>, %73, %cst_30 [0] : vector<1x8x128xf32> to vector<8x128xf32>
      %75 = arith.addf %70, %74 : vector<8x128xf32>
      %c0_31 = arith.constant 0 : index
      %c0_32 = arith.constant 0 : index
      %c0_33 = arith.constant 0 : index
      %76 = vector.load %arg5[%c0_31, %c0_32, %c0_33] : memref<1x8x128xf32, #tpu.memory_space<vmem>>, vector<1x8x128xf32>
      %77 = vector.shape_cast %76 : vector<1x8x128xf32> to vector<8x128xf32>
      %78 = vector.shape_cast %75 : vector<8x128xf32> to vector<1x8x128xf32>
      tpu.vector_store %arg5[%c0_31, %c0_32, %c0_33], %78 {strides = array<i32>} : memref<1x8x128xf32, #tpu.memory_space<vmem>>, vector<1x8x128xf32>,
      %c0_34 = arith.constant 0 : index
      %c0_35 = arith.constant 0 : index
      %c0_36 = arith.constant 0 : index
      %79 = vector.load %arg4[%c0_34, %c0_35, %c0_36] : memref<1x8x128xf32, #tpu.memory_space<vmem>>, vector<1x8x128xf32>
      %80 = vector.shape_cast %79 : vector<1x8x128xf32> to vector<8x128xf32>
      %cst_37 = arith.constant 0.000000e+00 : f32
      %81 = vector.broadcast %cst_37 : f32 to vector<8x128xf32>
      %82 = arith.select %68, %49, %81 : vector<8x128xi1>, vector<8x128xf32>
      %83 = vector.shape_cast %82 : vector<8x128xf32> to vector<1x8x128xf32>
      %cst_38 = arith.constant dense<0.000000e+00> : vector<8x128xf32>
      %84 = vector.multi_reduction <add>, %83, %cst_38 [0] : vector<1x8x128xf32> to vector<8x128xf32>
      %85 = arith.addf %80, %84 : vector<8x128xf32>
      %c0_39 = arith.constant 0 : index
      %c0_40 = arith.constant 0 : index
      %c0_41 = arith.constant 0 : index
      %86 = vector.load %arg4[%c0_39, %c0_40, %c0_41] : memref<1x8x128xf32, #tpu.memory_space<vmem>>, vector<1x8x128xf32>
      %87 = vector.shape_cast %86 : vector<1x8x128xf32> to vector<8x128xf32>
      %88 = vector.shape_cast %85 : vector<8x128xf32> to vector<1x8x128xf32>
      tpu.vector_store %arg4[%c0_39, %c0_40, %c0_41], %88 {strides = array<i32>} : memref<1x8x128xf32, #tpu.memory_space<vmem>>, vector<1x8x128xf32>,
    } else {
    }
    return
  }
  func.func @transform_0(%arg0: i32, %arg1: i32) -> (i32, i32, i32) {
    %c1_i32 = arith.constant 1 : i32
    %0 = arith.muli %arg0, %c1_i32 : i32
    %1 = arith.addi %0, %arg1 : i32
    %c0_i32 = arith.constant 0 : i32
    %c0_i32_0 = arith.constant 0 : i32
    %c0_i32_1 = arith.constant 0 : i32
    return %c0_i32, %1, %c0_i32_0 : i32, i32, i32
  }
  func.func @transform_1(%arg0: i32, %arg1: i32) -> (i32, i32, i32) {
    %c1_i32 = arith.constant 1 : i32
    %0 = arith.muli %arg0, %c1_i32 : i32
    %1 = arith.addi %0, %arg1 : i32
    %c0_i32 = arith.constant 0 : i32
    %c0_i32_0 = arith.constant 0 : i32
    %c0_i32_1 = arith.constant 0 : i32
    return %c0_i32, %1, %c0_i32_0 : i32, i32, i32
  }
  func.func @transform_2(%arg0: i32, %arg1: i32) -> (i32, i32, i32) {
    %c0_i32 = arith.constant 0 : i32
    %c0_i32_0 = arith.constant 0 : i32
    %c0_i32_1 = arith.constant 0 : i32
    return %arg0, %c0_i32, %c0_i32_0 : i32, i32, i32
  }
  func.func @transform_3(%arg0: i32, %arg1: i32) -> (i32, i32, i32) {
    %c0_i32 = arith.constant 0 : i32
    %c0_i32_0 = arith.constant 0 : i32
    %c0_i32_1 = arith.constant 0 : i32
    return %arg0, %c0_i32, %c0_i32_0 : i32, i32, i32
  }
}

</mosaic_0001>

<bundles_post_ra>
// kernel: iou_loss.1
= control target key start
LH: loop header
LB: loop body
LE: loop exit
PB: predicated region body
PF: predicated region fallthrough
CT: control target
= control target key end

     0   :  { %v111_v26 = vlaneseq  ;;  %s203_s0 = inlined_call_operand.vmem [shape: f32[3,8,128], index: 0, kind: input, shape index: {}]   ;;  %s204_s1 = inlined_call_operand.vmem [shape: f32[3,8,128], index: 1, kind: input, shape index: {}]   ;;  %s205_s3 = inlined_call_operand.vmem [shape: f32[1,8,128], index: 3, kind: output, shape index: {1}]   ;;  %s206_s2 = inlined_call_operand.vmem [shape: f32[1,8,128], index: 2, kind: output, shape index: {0}]  }
   0x1   :  { %v53_v0 = vld [vmem:[%s203_s0] sm:$0xff]  ;;  %v150_v1 = vld [vmem:[%s203_s0 + $0x8] sm:$0xff]  ;;  %v151_v2 = vld [vmem:[%s203_s0 + $0x10] sm:$0xff] }
   0x2   :  { %v58_v3 = vld [vmem:[%s204_s1] sm:$0xff]  ;;  %v152_v4 = vld [vmem:[%s204_s1 + $0x8] sm:$0xff]  ;;  %v153_v5 = vld [vmem:[%s204_s1 + $0x10] sm:$0xff]  ;;  %v77_v9 = vmul.f32 %v151_v2, %v151_v2  ;;  %v112_v27 = vshrl.u32 %v111_v26, 7  ;;  %v114_v28 = vand.u32 127, %v111_v26 }
   0x3   :  { %v64_v6 = vsub.f32 %v151_v2, %v153_v5  ;;  %v66_v7 = vsub.f32 %v53_v0, %v58_v3  ;;  %v71_v8 = vsub.f32 %v150_v1, %v152_v4  ;;  %v78_v10 = vmul.f32 %v153_v5, %v153_v5 }
   0x4   :  { %v63_v11 = vadd.f32 %v153_v5, %v151_v2  ;;  %v115_v29 = vmul.u32 128, %v112_v27 }
   0x5   :  { %v65_v12 = vand.u32 2147483647, %v64_v6  ;;  %v67_v13 = vand.u32 2147483647, %v66_v7  ;;  %v72_v14 = vand.u32 2147483647, %v71_v8  ;;  %v79_v17 = vadd.f32 %v78_v10, %v77_v9 }
   0x6   :  { %v118_v32 = vadd.s32 %v115_v29, %v114_v28 }
   0x7   :  { %v68_v15 = vmax.f32 %v67_v13, %v65_v12  ;;  %v73_v16 = vmax.f32 %v72_v14, %v65_v12  ;;  %v80_v22 = vmul.f32 4.0, %v79_v17 }
   0x8   :  { %vm119_vm0 = vcmp.lt.s32.totalorder %v118_v32, 8 }
   0x9   :  { %v69_v18 = vsub.f32 %v63_v11, %v68_v15  ;;  %v74_v19 = vsub.f32 %v63_v11, %v73_v16 }
   0xb   :  { %v70_v20 = vmax.f32 %v69_v18, 0.0  ;;  %v75_v21 = vmax.f32 %v74_v19, 0.0 }
   0xd   :  { %v76_v23 = vmul.f32 %v75_v21, %v70_v20 }
   0xf   :  { %v81_v24 = vsub.f32 %v80_v22, %v76_v23 }
  0x11   :  { %v82_v25 = vadd.f32 1e-07, %v81_v24 }
  0x13   :  { %155 = vrcp.f32 %v82_v25 }
  0x20   :  { %v156_v30 = vpop.eup %155 }
  0x21   :  { %v84_v31 = vmul.f32 %v156_v30, %v82_v25 }
  0x23   :  { %v85_v33 = vsub.f32 2.0, %v84_v31 }
  0x25   :  { %v86_v34 = vmul.f32 %v156_v30, %v85_v33 }
  0x27   :  { %v87_v35 = vmul.f32 %v86_v34, %v76_v23 }
  0x29   :  { %v88_v36 = vadd.f32 1e-07, %v87_v35  ;;  %v121_v37 = vsel %vm119_vm0, %v87_v35, 0.0 }
  0x2a   :  { %124 = vst [vmem:[%s205_s3] sm:$0xff] %v121_v37 }
  0x2b   :  { %157 = vlog2.f32 %v88_v36 }
  0x38   :  { %v158_v38 = vpop.eup %157 }
  0x39   :  { %v90_v39 = vmul.f32 0.6931472, %v158_v38 }
  0x3b   :  { %v91_v40 = vsub.f32 0.0, %v90_v39 }
  0x3d   :  { %v126_v41 = vsel %vm119_vm0, %v91_v40, 0.0 }
  0x3e   :  { %129 = vst [vmem:[%s206_s2] sm:$0xff] %v126_v41 }

</bundles_post_ra>
